<compile_context>
chip_gen: v7x
topology: tpu7x:2x2x1
jax: 0.10.0
libtpu: 0.0.40
codegen_flags: <defaults>
</compile_context>

<pallas_src>
import functools

import jax
import jax.numpy as jnp
from jax.experimental import pallas as pl
from jax.experimental.pallas import tpu as pltpu


def _round_up(x, m):
    return ((x + m - 1) // m) * m


def _mlp_softmax_kernel(x_ref, w1_ref, b1_ref, w2_ref, b2_ref, out_ref, *,
                        compute_dtype):
    """Fused 2-layer MLP: softmax(relu(x@w1+b1) @ w2 + b2, axis=-1).

    x_ref:  [TM, D_in]  f32
    w1_ref: [D_in, H]   f32
    b1_ref: [1, H]      f32
    w2_ref: [H, C]      f32
    b2_ref: [1, C]      f32
    out_ref:[TM, C]     out dtype (f32 or bf16)
    """
    x = x_ref[...]
    w1 = w1_ref[...]
    w2 = w2_ref[...]
    if compute_dtype is not None:
        # Cast MXU inputs in-kernel (no extra XLA pass over x in HBM);
        # accumulation stays f32 via preferred_element_type.
        x = x.astype(compute_dtype)
        w1 = w1.astype(compute_dtype)
        w2 = w2.astype(compute_dtype)

    # layer1: Linear(in -> hidden) on the MXU, f32 accumulate, + ReLU (VPU).
    h = jnp.dot(x, w1, preferred_element_type=jnp.float32)
    h = jnp.maximum(h + b1_ref[...], 0.0)
    if compute_dtype is not None:
        h = h.astype(compute_dtype)

    # layer2: Linear(hidden -> C), f32 accumulate.
    logits = jnp.dot(h, w2, preferred_element_type=jnp.float32) + b2_ref[...]

    # Numerically stable softmax over the class axis (all f32).
    m = jnp.max(logits, axis=-1, keepdims=True)
    e = jnp.exp(logits - m)
    denom = jnp.sum(e, axis=-1, keepdims=True)
    out_ref[...] = (e / denom).astype(out_ref.dtype)  # exact normalization


def custom_classifier_forward(x, w1, b1, w2, b2, *, block_m=2048,
                              compute_dtype=None, out_dtype=jnp.float32):
    """Fused forward pass of CustomClassifier as a single Pallas TPU kernel.

    x:  [B, D_in] f32
    w1: [D_in, H] f32, b1: [H] or [1, H]
    w2: [H, C]    f32, b2: [C] or [1, C]
    compute_dtype: optional (e.g. jnp.bfloat16) for MXU inputs only.
    out_dtype: dtype of the stored probabilities (f32 default, bf16 halves
               output HBM write traffic).
    returns softmax probabilities [B, C].
    """
    B, D_in = x.shape
    H = w1.shape[1]
    C = w2.shape[1]

    b1r = jnp.asarray(b1, jnp.float32).reshape(1, H)
    b2r = jnp.asarray(b2, jnp.float32).reshape(1, C)

    # Batch tile: multiple of 8, big enough to amortize per-step pipeline
    # overhead, but keep >= 2 grid steps when B allows so the "parallel"
    # axis can shard across the 2 TensorCores on v7x.
    tm = min(block_m, _round_up(B, 8))
    if B > 8 and pl.cdiv(B, tm) < 2:
        tm = _round_up(pl.cdiv(B, 2), 8)
    num_tiles = pl.cdiv(B, tm)   # ragged tail handled by Pallas edge masking

    kernel = functools.partial(_mlp_softmax_kernel, compute_dtype=compute_dtype)

    return pl.pallas_call(
        kernel,
        out_shape=jax.ShapeDtypeStruct((B, C), out_dtype),
        grid=(num_tiles,),
        in_specs=[
            # activations stream with the grid
            pl.BlockSpec((tm, D_in), lambda i: (i, 0)),
            # weights / biases: constant block index -> resident in VMEM
            pl.BlockSpec((D_in, H), lambda i: (0, 0)),
            pl.BlockSpec((1, H), lambda i: (0, 0)),
            pl.BlockSpec((H, C), lambda i: (0, 0)),
            pl.BlockSpec((1, C), lambda i: (0, 0)),
        ],
        out_specs=pl.BlockSpec((tm, C), lambda i: (i, 0)),
        compiler_params=pltpu.CompilerParams(
            dimension_semantics=("parallel",),   # shard batch tiles over TCs
        ),
    )(x, w1, b1r, w2, b2r)


def _reference_forward(x, w1, b1, w2, b2):
    h = jnp.maximum(x @ w1 + jnp.reshape(b1, (1, -1)), 0.0)
    logits = h @ w2 + jnp.reshape(b2, (1, -1))
    return jax.nn.softmax(logits, axis=-1)


if __name__ == "__main__":
    key = jax.random.PRNGKey(0)
    k_x, k_w1, k_w2, k_xl = jax.random.split(key, 4)

    in_features = 16
    hidden = 32          # layer1 width from the module
    num_classes = 10     # CustomClassifier(num_classes=10)

    # Deterministic parameter init (Kaiming-ish scaling), biases zero.
    w1 = jax.random.normal(k_w1, (in_features, hidden), dtype=jnp.float32) * (
        1.0 / jnp.sqrt(in_features))
    b1 = jnp.zeros((hidden,), dtype=jnp.float32)
    w2 = jax.random.normal(k_w2, (hidden, num_classes), dtype=jnp.float32) * (
        1.0 / jnp.sqrt(hidden))
    b2 = jnp.zeros((num_classes,), dtype=jnp.float32)

    # --- small batch (module-scale) sanity check, full f32 path -----------
    batch = 8
    x = jax.random.normal(k_x, (batch, in_features), dtype=jnp.float32)
    out = jax.block_until_ready(custom_classifier_forward(x, w1, b1, w2, b2))
    ref = _reference_forward(x, w1, b1, w2, b2)
    assert out.shape == (batch, num_classes)
    assert jnp.allclose(out, ref, atol=2e-3, rtol=2e-3)
    assert jnp.allclose(jnp.sum(out, axis=-1), 1.0, atol=1e-3)

    # --- larger, non-multiple batch exercising the batch-tiled grid -------
    big_batch = 1000
    xl = jax.random.normal(k_xl, (big_batch, in_features), dtype=jnp.float32)
    out_l = jax.block_until_ready(
        custom_classifier_forward(xl, w1, b1, w2, b2))
    ref_l = _reference_forward(xl, w1, b1, w2, b2)
    assert out_l.shape == (big_batch, num_classes)
    assert jnp.allclose(out_l, ref_l, atol=2e-3, rtol=2e-3)
    assert jnp.allclose(jnp.sum(out_l, axis=-1), 1.0, atol=1e-3)

    # --- bf16 MXU-input path (cast in-kernel), f32 softmax math -----------
    out_bf = jax.block_until_ready(
        custom_classifier_forward(xl, w1, b1, w2, b2,
                                  compute_dtype=jnp.bfloat16))
    assert out_bf.shape == (big_batch, num_classes)
    assert jnp.allclose(out_bf, ref_l, atol=5e-2)
    assert jnp.allclose(jnp.sum(out_bf, axis=-1), 1.0, atol=1e-3)

    # --- bf16 output path (halves HBM write traffic) -----------------------
    out_b16 = jax.block_until_ready(
        custom_classifier_forward(xl, w1, b1, w2, b2,
                                  out_dtype=jnp.bfloat16))
    assert out_b16.dtype == jnp.bfloat16
    assert jnp.allclose(out_b16.astype(jnp.float32), ref_l, atol=3e-2)
    assert jnp.allclose(jnp.sum(out_b16.astype(jnp.float32), axis=-1),
                        1.0, atol=3e-2)

    # TODO(synk): fit/evaluate/predict training loop (CrossEntropyLoss, SGD)
    # is not part of the forward pass and is left to JAX autodiff/optax.
    print("KERNEL_OK")
</pallas_src>

<mosaic_0001>
module attributes {stable_mosaic.version = 11 : i64} {
  func.func @_mlp_softmax_kernel(%arg0: i32, %arg1: memref<8x16xf32, #tpu.memory_space<vmem>>, %arg2: memref<16x32xf32, #tpu.memory_space<vmem>>, %arg3: memref<1x32xf32, #tpu.memory_space<vmem>>, %arg4: memref<32x10xf32, #tpu.memory_space<vmem>>, %arg5: memref<1x10xf32, #tpu.memory_space<vmem>>, %arg6: memref<8x10xf32, #tpu.memory_space<vmem>>) attributes {dimension_semantics = [#tpu.dimension_semantics<parallel>], iteration_bounds = array<i64: 1>, scalar_prefetch = 0 : i64, scratch_operands = 0 : i64, tpu.core_type = #tpu.core_type<tc>, window_params = [{transform_indices = @transform_0, window_bounds = array<i64: 8, 16>}, {pipeline_mode = #tpu.pipeline_mode<synchronous>, transform_indices = @transform_1, window_bounds = array<i64: 16, 32>}, {pipeline_mode = #tpu.pipeline_mode<synchronous>, transform_indices = @transform_2, window_bounds = array<i64: 1, 32>}, {pipeline_mode = #tpu.pipeline_mode<synchronous>, transform_indices = @transform_3, window_bounds = array<i64: 32, 10>}, {pipeline_mode = #tpu.pipeline_mode<synchronous>, transform_indices = @transform_4, window_bounds = array<i64: 1, 10>}, {transform_indices = @transform_5, window_bounds = array<i64: 8, 10>}]} {
    %c0 = arith.constant 0 : index
    %c0_0 = arith.constant 0 : index
    %0 = vector.load %arg1[%c0, %c0_0] : memref<8x16xf32, #tpu.memory_space<vmem>>, vector<8x16xf32>
    %c0_1 = arith.constant 0 : index
    %c0_2 = arith.constant 0 : index
    %1 = vector.load %arg2[%c0_1, %c0_2] : memref<16x32xf32, #tpu.memory_space<vmem>>, vector<16x32xf32>
    %c0_3 = arith.constant 0 : index
    %c0_4 = arith.constant 0 : index
    %2 = vector.load %arg4[%c0_3, %c0_4] : memref<32x10xf32, #tpu.memory_space<vmem>>, vector<32x10xf32>
    %cst = arith.constant dense<0.000000e+00> : vector<8x32xf32>
    %3 = tpu.matmul %0, %1, %cst {dimension_numbers = #tpu.dot_dimension_numbers<[1], [0], [0], [1], [0, 0, 1, 1], [], []>} : vector<8x16xf32>, vector<16x32xf32>, vector<8x32xf32> -> vector<8x32xf32>
    %c0_5 = arith.constant 0 : index
    %c0_6 = arith.constant 0 : index
    %4 = vector.load %arg3[%c0_5, %c0_6] : memref<1x32xf32, #tpu.memory_space<vmem>>, vector<1x32xf32>
    %5 = vector.broadcast %4 : vector<1x32xf32> to vector<8x32xf32>
    %6 = arith.addf %3, %5 : vector<8x32xf32>
    %cst_7 = arith.constant 0.000000e+00 : f32
    %7 = vector.broadcast %cst_7 : f32 to vector<8x32xf32>
    %8 = arith.maximumf %6, %7 : vector<8x32xf32>
    %cst_8 = arith.constant dense<0.000000e+00> : vector<8x10xf32>
    %9 = tpu.matmul %8, %2, %cst_8 {dimension_numbers = #tpu.dot_dimension_numbers<[1], [0], [0], [1], [0, 0, 1, 1], [], []>} : vector<8x32xf32>, vector<32x10xf32>, vector<8x10xf32> -> vector<8x10xf32>
    %c0_9 = arith.constant 0 : index
    %c0_10 = arith.constant 0 : index
    %10 = vector.load %arg5[%c0_9, %c0_10] : memref<1x10xf32, #tpu.memory_space<vmem>>, vector<1x10xf32>
    %11 = vector.broadcast %10 : vector<1x10xf32> to vector<8x10xf32>
    %12 = arith.addf %9, %11 : vector<8x10xf32>
    %cst_11 = arith.constant dense<0xFF800000> : vector<8xf32>
    %13 = vector.multi_reduction <maximumf>, %12, %cst_11 [1] : vector<8x10xf32> to vector<8xf32>
    %14 = vector.shape_cast %13 : vector<8xf32> to vector<8x1xf32>
    %15 = vector.broadcast %14 : vector<8x1xf32> to vector<8x10xf32>
    %16 = arith.subf %12, %15 : vector<8x10xf32>
    %17 = math.exp %16 : vector<8x10xf32>
    %cst_12 = arith.constant dense<0.000000e+00> : vector<8xf32>
    %18 = vector.multi_reduction <add>, %17, %cst_12 [1] : vector<8x10xf32> to vector<8xf32>
    %19 = vector.shape_cast %18 : vector<8xf32> to vector<8x1xf32>
    %20 = vector.broadcast %19 : vector<8x1xf32> to vector<8x10xf32>
    %21 = arith.divf %17, %20 : vector<8x10xf32>
    %c0_13 = arith.constant 0 : index
    %c0_14 = arith.constant 0 : index
    %22 = vector.load %arg6[%c0_13, %c0_14] : memref<8x10xf32, #tpu.memory_space<vmem>>, vector<8x10xf32>
    tpu.vector_store %arg6[%c0_13, %c0_14], %21 {strides = array<i32>} : memref<8x10xf32, #tpu.memory_space<vmem>>, vector<8x10xf32>,
    return
  }
  func.func @transform_0(%arg0: i32) -> (i32, i32) {
    %c0_i32 = arith.constant 0 : i32
    %c0_i32_0 = arith.constant 0 : i32
    return %arg0, %c0_i32 : i32, i32
  }
  func.func @transform_1(%arg0: i32) -> (i32, i32) {
    %c0_i32 = arith.constant 0 : i32
    %c0_i32_0 = arith.constant 0 : i32
    %c0_i32_1 = arith.constant 0 : i32
    return %c0_i32, %c0_i32_0 : i32, i32
  }
  func.func @transform_2(%arg0: i32) -> (i32, i32) {
    %c0_i32 = arith.constant 0 : i32
    %c0_i32_0 = arith.constant 0 : i32
    %c0_i32_1 = arith.constant 0 : i32
    return %c0_i32, %c0_i32_0 : i32, i32
  }
  func.func @transform_3(%arg0: i32) -> (i32, i32) {
    %c0_i32 = arith.constant 0 : i32
    %c0_i32_0 = arith.constant 0 : i32
    %c0_i32_1 = arith.constant 0 : i32
    return %c0_i32, %c0_i32_0 : i32, i32
  }
  func.func @transform_4(%arg0: i32) -> (i32, i32) {
    %c0_i32 = arith.constant 0 : i32
    %c0_i32_0 = arith.constant 0 : i32
    %c0_i32_1 = arith.constant 0 : i32
    return %c0_i32, %c0_i32_0 : i32, i32
  }
  func.func @transform_5(%arg0: i32) -> (i32, i32) {
    %c0_i32 = arith.constant 0 : i32
    %c0_i32_0 = arith.constant 0 : i32
    return %arg0, %c0_i32 : i32, i32
  }
}

</mosaic_0001>

<bundles_post_ra>
// kernel: tpu_custom_call.1
= control target key start
LH: loop header
LB: loop body
LE: loop exit
PB: predicated region body
PF: predicated region fallthrough
CT: control target
= control target key end

     0   :  { %v289_v2 = vmov 0.0|0.0   ;;  %vm290_vm0 = vmmov 0   ;;  %v291_v4 = vmov 0.0   ;;  %s365_s0 = inlined_call_operand.vmem [shape: f32[8,16], index: 0, kind: input, shape index: {}]   ;;  %s366_s1 = inlined_call_operand.vmem [shape: f32[16,32], index: 1, kind: input, shape index: {}]   ;;  %s367_s2 = inlined_call_operand.vmem [shape: f32[1,32], index: 2, kind: input, shape index: {}]   ;;  %s368_s3 = inlined_call_operand.vmem [shape: f32[32,10], index: 3, kind: input, shape index: {}]   ;;  %s369_s4 = inlined_call_operand.vmem [shape: f32[1,10], index: 4, kind: input, shape index: {}]   ;;  %s370_s5 = inlined_call_operand.hbm [shape: f32[8,10], index: 5, kind: output, shape index: {}]  }
   0x1   :  { %v22_v0 = vld [vmem:[%s366_s1] sm:$0xff]  ;;  %v23_v1 = vld [vmem:[%s366_s1 + $0x8] sm:$0xff]  ;;  %248 = vmatprep.subr.bf16.mxu0 %v289_v2  ;;  %234 = vmatprep.mubr.msk.f32.mxu0 %vm290_vm0, %v291_v4 }
   0x2   :  { %v249_v3 = vpack.c.bf16 %v23_v1, %v22_v0  ;;  %v24_v5 = vld [vmem:[%s368_s3] sm:$0xff]  ;;  %v25_v6 = vld [vmem:[%s368_s3 + $0x8] sm:$0xff]  ;;  %251 = vmatprep.subr.bf16.mxu1 %v289_v2  ;;  %245 = vmatprep.mubr.msk.f32.mxu1 %vm290_vm0, %v291_v4 }
   0x3   :  { %v252_v7 = vpack.c.bf16 %v25_v6, %v24_v5 }
   0x4   :  { %10 = vsyncpa [#allocation3], 0  ;;  %250 = vmatpush3.bf16.msra.mxu0 %v249_v3  ;;  %v21_v8 = vld [vmem:[%s365_s0] sm:$0xff]  ;;  %vm35_vm1 = vcmask 130048   ;;  %v26_v9 = vld [vmem:[%s368_s3 + $0x10] sm:$0xff]  ;;  %vm117_vm2 = vcmask 261120  }
   0x5   :  { %253 = vmatpush3.bf16.msra.mxu1 %v252_v7  ;;  %v27_v10 = vld [vmem:[%s368_s3 + $0x18] sm:$0xff]  ;;  %v218_v12 = vld [vmem:[%s367_s2] ss:$0 sm:$0xff]  ;;  %vm191_vm3 = vcmask 80896   ;;  %s292_s2 = smov [#allocation2]  }
   0x6   :  { %254 = vmatprep.subr.bf16.mxu1 %v289_v2  ;;  %v255_v11 = vpack.c.bf16 %v27_v10, %v26_v9  ;;  %v220_v17 = vld [vmem:[%s369_s4] ss:$0 sm:$0xff]  ;;  %s210_s3 = sshll.u32 %s292_s2, 4  ;;  %s211_s3 = int_to_ptr.vmem [resolvable:$true] %s210_s3 }
   0x7   :  { %235 = vmatmul.mubr.msk.f32.vlgmr.msra.gmra.mrb[0].mxu0 %vm35_vm1, %v21_v8  ;;  %s265_s4 = scalar_lea.vmem %s211_s3, 128  ;;  %p270_p1 = scmp.lt.s32.totalorder %s211_s3, %s211_s3 }
   0x8   :  { %p266_p0 = scmp.ne.s32.totalorder %s211_s3, %s265_s4  ;;  %p271_p2 = scmp.lt.s32.totalorder %s265_s4, %s265_s4 }
   0x9   :  { %256 = vmatpush3.bf16.msra.mxu1 %v255_v11 }
   0xa   :  { %p272_p3 = por %p271_p2, %p270_p1 }
   0xc   :  { %p273_p4 = pnand %p272_p3, %p266_p0 }
  0xda   :  { %v105_v13 = vpop.f32.mrb[0].mxu0 }
  0xdb   :  { %v106_v14 = vadd.f32 %v218_v12, %v105_v13  ;;  %v236_v15 = vpop.f32.mrb[1].mxu0 }
  0xdd   :  { %v109_v16 = vmax.f32 %v106_v14, 0.0 }
  0xdf   :  { %246 = vmatmul.mubr.msk.f32.vlgmr.msra.gmra.mrb[0].mxu1 %vm117_vm2, %v109_v16 }
 0x1b2   :  { %v187_v18 = vpop.f32.mrb[0].mxu1 }
 0x1b3   :  { %v188_v19 = vadd.f32 %v220_v17, %v187_v18  ;;  %v247_v20 = vpop.f32.mrb[1].mxu1 }
 0x1b5   :  { %v192_v21 = vsel %vm191_vm3, %v188_v19, -inf }
 0x1b6   :  { %193 = vmax.xlane.f32.xlu0 %v192_v21 }
 0x243   :  { %v194_v22 = vpop.xlane.xlu0 %193 }
 0x244   :  { %v195_v23 = vsub.f32 %v188_v19, %v194_v22 }
 0x246   :  { %v196_v24 = vmul.f32 1.442695, %v195_v23 }
 0x248   :  { %261 = vpow2.f32 %v196_v24 }
 0x252   :  { %v262_v25 = vpop.eup %261 }
 0x253   :  { %v198_v26 = vsel %vm191_vm3, %v262_v25, 0.0 }
 0x254   :  { %199 = vadd.xlane.f32.xlu0 %v198_v26 }
 0x2e1   :  { %v200_v27 = vpop.xlane.xlu0 %199 }
 0x2e2   :  { %263 = vrcp.f32 %v200_v27 }
 0x2ec   :  { %v264_v28 = vpop.eup %263 }
 0x2ed   :  { %v202_v29 = vmul.f32 %v264_v28, %v262_v25 }
 0x2ef   :  { %203 = vst.msk [vmem:[#allocation2] sm:$0xff] %vm191_vm3, %v202_v29 }
 0x2f0   :  { %276 = shalt.err (!%p273_p4)
}
 0x2f1   :  { %s277_s11 = scalar_lea.hbm %s370_s5, 128 }
 0x2f2   :  { %p278_p5 = scmp.ne.s32.totalorder %s370_s5, %s277_s11  ;;  %p281_p6 = scmp.lt.u32.totalorder %s277_s11, %s370_s5 }
 0x2f4   :  { %p283_p7 = pnand %p281_p6, %p278_p5 }
 0x2f6   :  { %286 = shalt.err (!%p283_p7)
}
 0x2f7   :  { %213 = dma.vmem_to_hbm [thread:$0]  %s211_s3, 128, %s370_s5, [#allocation3]  }
 0x2f8   :  { %287 = dma.done.wait [#allocation3], 128  }
 0x2f9   :  { %288 = vsyncadd [#allocation3], 4294967168 }
 0x2fa   :  { %217 = vsyncpa [#allocation3], 1 }

</bundles_post_ra>
